<compile_context>
chip_gen: v5e
topology: v5e:2x2
jax: 0.10.0
libtpu: 0.0.40
codegen_flags: <defaults>
</compile_context>

<pallas_src>
import functools

import jax
import jax.numpy as jnp
from jax.experimental import pallas as pl
from jax.experimental.pallas import tpu as pltpu


def _pe_scale_kernel(alpha_ref, x_ref, o_ref):
    # alpha_ref: (1, D) f32 row, broadcasts over the sublane (row) axis.
    o_ref[...] = (x_ref[...] * alpha_ref[...]).astype(o_ref.dtype)


def _round_up(v, m):
    return ((v + m - 1) // m) * m


def _pick_row_block(M, D, itemsize, vmem_budget_bytes=4 << 20, max_rows=8192):
    """Largest multiple-of-8 row block within a per-tile VMEM budget."""
    rows_by_budget = max(8, vmem_budget_bytes // max(1, D * itemsize))
    rows = min(max_rows, rows_by_budget, max(8, _round_up(M, 8)))
    return max(8, (rows // 8) * 8)


@functools.partial(jax.jit, static_argnames=("n", "d", "tau"))
def _progressive_encode(x, t, *, n, d, tau):
    """out[r, c] = x[r, c] * alpha[c], alpha built from scalar step t."""
    M, D = x.shape
    assert D == d + 2 * n, "feature axis must be d + 2*mapping_size"

    # (1, D) alpha row, computed once per call in plain JAX (not per element).
    idx = jnp.arange(n, dtype=jnp.float32)
    core = jnp.clip((t - tau * idx) / tau, 0.0, 1.0)
    alpha_row = jnp.concatenate(
        [jnp.ones((d,), jnp.float32), core, core])[None, :]

    rows = _pick_row_block(M, D, x.dtype.itemsize)
    grid = (pl.cdiv(M, rows),)   # ragged tail handled by masked reads/writes

    return pl.pallas_call(
        _pe_scale_kernel,
        out_shape=jax.ShapeDtypeStruct((M, D), x.dtype),
        grid_spec=pltpu.PrefetchScalarGridSpec(
            num_scalar_prefetch=0,
            grid=grid,
            in_specs=[
                pl.BlockSpec((1, D), lambda i: (0, 0)),      # alpha (resident)
                pl.BlockSpec((rows, D), lambda i: (i, 0)),   # x row tile
            ],
            out_specs=pl.BlockSpec((rows, D), lambda i: (i, 0)),
        ),
        compiler_params=pltpu.CompilerParams(
            dimension_semantics=("parallel",)),
    )(alpha_row, x)


class ProgressiveEncoding:
    """JAX/Pallas port of the PyTorch ProgressiveEncoding module.

    Note: the step counter `self._t` is host-side Python state, matching the
    PyTorch module's eager semantics. It is not functional under jit/vmap/scan
    of the caller; for fully traced training loops pass t explicitly to
    `_progressive_encode`.
    """

    def __init__(self, mapping_size, T, d=3, apply=True):
        self._t = 0
        self.n = mapping_size
        self.T = T
        self.d = d
        self._tau = 2 * self.n / self.T
        self.apply = apply

    def __call__(self, x):
        t = self._t
        self._t += 1
        if not self.apply:
            # alpha is all ones -> identity; skip the HBM read+write copy.
            return x
        t_dev = jnp.asarray(t, dtype=jnp.float32)
        return _progressive_encode(
            x, t_dev, n=self.n, d=self.d, tau=float(self._tau))


def _reference(x, t, n, d, tau, apply_flag):
    idx = jnp.arange(n, dtype=jnp.float32)
    alpha = jnp.clip((t - tau * idx) / tau, 0.0, 1.0)
    alpha = jnp.tile(alpha, 2)
    if not apply_flag:
        alpha = jnp.ones_like(alpha)
    alpha = jnp.concatenate([jnp.ones((d,), jnp.float32), alpha], axis=0)
    return (x.astype(jnp.float32) * alpha).astype(x.dtype)


if __name__ == "__main__":
    key = jax.random.PRNGKey(0)
    mapping_size = 32
    T = 10
    d = 3
    D = d + 2 * mapping_size    # 67

    # Exercise a nicely divisible row count and a ragged one, f32 and bf16.
    for M, dtype in ((16, jnp.float32), (13, jnp.float32), (24, jnp.bfloat16)):
        x = jax.random.normal(jax.random.fold_in(key, M), (M, D),
                              dtype=jnp.float32).astype(dtype)
        pe = ProgressiveEncoding(mapping_size, T, d=d, apply=True)
        for step in range(3):           # exercise the internal counter
            t_before = pe._t
            out = jax.block_until_ready(pe(x))
            ref = _reference(x, float(t_before), mapping_size, d, pe._tau, True)
            assert out.shape == x.shape and out.dtype == x.dtype
            tol = 1e-6 if dtype == jnp.float32 else 2e-2
            assert jnp.allclose(out.astype(jnp.float32),
                                ref.astype(jnp.float32),
                                atol=tol, rtol=tol), (M, step, dtype)

    # apply=False path: identity, no kernel launch / HBM copy; t still ticks.
    x = jax.random.normal(key, (16, D), dtype=jnp.float32)
    pe_off = ProgressiveEncoding(mapping_size, T, d=d, apply=False)
    out = jax.block_until_ready(pe_off(x))
    assert jnp.allclose(out, _reference(x, 0.0, mapping_size, d,
                                        pe_off._tau, False))
    assert pe_off._t == 1

    print("KERNEL_OK")
</pallas_src>

<mosaic_0001>
module attributes {stable_mosaic.version = 11 : i64} {
  func.func @_pe_scale_kernel(%arg0: i32, %arg1: memref<1x67xf32, #tpu.memory_space<vmem>>, %arg2: memref<16x67xf32, #tpu.memory_space<vmem>>, %arg3: memref<16x67xf32, #tpu.memory_space<vmem>>) attributes {dimension_semantics = [#tpu.dimension_semantics<parallel>], iteration_bounds = array<i64: 1>, scalar_prefetch = 0 : i64, scratch_operands = 0 : i64, tpu.core_type = #tpu.core_type<tc>, window_params = [{pipeline_mode = #tpu.pipeline_mode<synchronous>, transform_indices = @transform_0, window_bounds = array<i64: 1, 67>}, {transform_indices = @transform_1, window_bounds = array<i64: 16, 67>}, {transform_indices = @transform_2, window_bounds = array<i64: 16, 67>}]} {
    %c0 = arith.constant 0 : index
    %c0_0 = arith.constant 0 : index
    %0 = vector.load %arg2[%c0, %c0_0] : memref<16x67xf32, #tpu.memory_space<vmem>>, vector<16x67xf32>
    %c0_1 = arith.constant 0 : index
    %c0_2 = arith.constant 0 : index
    %1 = vector.load %arg1[%c0_1, %c0_2] : memref<1x67xf32, #tpu.memory_space<vmem>>, vector<1x67xf32>
    %2 = vector.broadcast %1 : vector<1x67xf32> to vector<16x67xf32>
    %3 = arith.mulf %0, %2 : vector<16x67xf32>
    %c0_3 = arith.constant 0 : index
    %c0_4 = arith.constant 0 : index
    %4 = vector.load %arg3[%c0_3, %c0_4] : memref<16x67xf32, #tpu.memory_space<vmem>>, vector<16x67xf32>
    tpu.vector_store %arg3[%c0_3, %c0_4], %3 {strides = array<i32>} : memref<16x67xf32, #tpu.memory_space<vmem>>, vector<16x67xf32>,
    return
  }
  func.func @transform_0(%arg0: i32) -> (i32, i32) {
    %c0_i32 = arith.constant 0 : i32
    %c0_i32_0 = arith.constant 0 : i32
    %c0_i32_1 = arith.constant 0 : i32
    return %c0_i32, %c0_i32_0 : i32, i32
  }
  func.func @transform_1(%arg0: i32) -> (i32, i32) {
    %c0_i32 = arith.constant 0 : i32
    %c0_i32_0 = arith.constant 0 : i32
    return %arg0, %c0_i32 : i32, i32
  }
  func.func @transform_2(%arg0: i32) -> (i32, i32) {
    %c0_i32 = arith.constant 0 : i32
    %c0_i32_0 = arith.constant 0 : i32
    return %arg0, %c0_i32 : i32, i32
  }
}

</mosaic_0001>

<bundles_post_ra>
// kernel: _progressive_encode.1
= control target key start
LH: loop header
LB: loop body
LE: loop exit
PB: predicated region body
PF: predicated region fallthrough
CT: control target
= control target key end

     0   :  { %7 = vsyncpa [#allocation3], 0  ;;  %s143_s0 = inlined_call_operand.vmem [shape: f32[1,67], index: 0, kind: input, shape index: {}]   ;;  %s144_s1 = inlined_call_operand.hbm [shape: f32[16,67], index: 1, kind: input, shape index: {}]   ;;  %s145_s2 = inlined_call_operand.hbm [shape: f32[16,67], index: 2, kind: output, shape index: {}]  }
   0x1   :  { %8 = vsyncpa [#allocation4], 0  ;;  %s15_s11 = sshll.u32 %s144_s1, 4  ;;  %s115_s12 = smov [#allocation2]   ;;  %s16_s11 = int_to_ptr.hbm [resolvable:$true] %s15_s11 }
   0x2   :  { %s17_s13 = sshll.u32 %s115_s12, 4  ;;  %s116_s14 = smov 128   ;;  %s18_s13 = int_to_ptr.vmem [resolvable:$true] %s17_s13 }
   0x3   :  { %s117_s15 = smov 8  }
   0x4   :  { %23 = dma.hbm_to_vmem [thread:$0]  %s16_s11, 256, %s18_s13, [#allocation3], %s116_s14, %s116_s14, %s117_s15  }
   0x5   :  { %111 = dma.done.wait [#allocation3], 256  }
   0x6   :  { %112 = vsyncadd [#allocation3], 4294967040  ;;  %s45_s18 = sshll.u32 %s145_s2, 4  ;;  %v28_v0 = vld [vmem:[#allocation2] sm:$0xff]  ;;  %s118_s21 = smov [#allocation5]   ;;  %vm36_vm0 = vcmask 547840   ;;  %s46_s18 = int_to_ptr.hbm [resolvable:$true] %s45_s18 }
   0x7   :  { %v62_v1 = vld [vmem:[%s143_s0] ss:$0 sm:$0xff]  ;;  %s43_s1 = sshll.u32 %s118_s21, 4  ;;  %v29_v2 = vld [vmem:[#allocation2 + $0x8] sm:$0xff]  ;;  %s44_s1 = int_to_ptr.vmem [resolvable:$true] %s43_s1 }
   0x8   :  { %v34_v3 = vmul.f32 %v62_v1, %v28_v0  ;;  %v35_v4 = vmul.f32 %v62_v1, %v29_v2 }
   0xa   :  { %37 = vst.msk [vmem:[#allocation5] sm:$0xff] %vm36_vm0, %v34_v3 }
   0xb   :  { %38 = vst.msk [vmem:[#allocation5 + $0x8] sm:$0xff] %vm36_vm0, %v35_v4 }
   0xc   :  { %51 = dma.vmem_to_hbm [thread:$0]  %s44_s1, 256, %s46_s18, [#allocation4], %s116_s14, %s116_s14, %s117_s15  }
   0xd   :  { %113 = dma.done.wait [#allocation4], 256  }
   0xe   :  { %114 = vsyncadd [#allocation4], 4294967040 }
   0xf   :  { %56 = vsyncpa [#allocation3], 1 }
  0x10   :  { %57 = vsyncpa [#allocation4], 1 }

</bundles_post_ra>
